<compile_context>
chip_gen: v7x
topology: tpu7x:2x2x1
jax: 0.10.0
libtpu: 0.0.40
codegen_flags: <defaults>
</compile_context>

<pallas_src>
import functools

import jax
import jax.numpy as jnp
from jax.experimental import pallas as pl
from jax.experimental.pallas import tpu as pltpu

TEMPERATURE = 1.0  # config.gate_softmax_temperature


def _round_up(v, m):
    return -(-v // m) * m


def _vmem_capacity_bytes():
    try:
        return int(pltpu.get_tpu_info().vmem_capacity_bytes)
    except Exception:
        return 64 << 20  # conservative: v7x per-core VMEM


def _pick_tile_t(T, D, E, x_itemsize, w_itemsize, usable_vmem):
    """Largest 128-multiple token tile that fits the VMEM budget."""
    per_token = 2 * D * x_itemsize + 2 * E * 4          # dbuf x tile + dbuf combine tile
    fixed = 2 * E * D * w_itemsize + 4 * 2 * E * 4 + (4 << 20)  # weight + stats + margin
    budget = max(usable_vmem - fixed, per_token * 128)
    tile = max((int(budget) // per_token) // 128 * 128, 128)
    tile = min(tile, 2048)
    if T >= 256:
        # At least two tiles so both v7x TensorCores get work and the DMA
        # pipeline has something to overlap with.
        tile = min(tile, _round_up((T + 1) // 2, 128))
    return int(tile)


def _top1gate_kernel(x_ref, wt_ref, combine_ref, stats_ref, *, total_tokens,
                     temperature):
    """One token tile: logits -> softmax -> top-1 -> combine[E, tile] + stats."""
    i = pl.program_id(0)

    x = x_ref[...]                        # [tile_t, D]  native dtype (no upcast)
    wt = wt_ref[...]                      # [D, E]       native dtype (pre-transposed)

    # logits = x @ w.T accumulated in f32 on the MXU in the natural
    # [tile_t, D] x [D, E] form, then one small transpose so every
    # subsequent op is lane-dense [E, tile_t].
    logits_te = jax.lax.dot_general(
        x, wt, dimension_numbers=(((1,), (0,)), ((), ())),
        preferred_element_type=jnp.float32)               # [tile_t, E]
    logits = jnp.transpose(logits_te)                     # [E, tile_t] f32
    if temperature != 1.0:                                # folded out when 1.0
        logits = logits * jnp.float32(1.0 / temperature)

    num_experts, tile_t = logits.shape
    n_valid = total_tokens - i * tile_t                   # in-bounds tokens here

    tok_ids = jax.lax.broadcasted_iota(jnp.int32, (1, tile_t), 1)
    valid = tok_ids < n_valid                             # [1, tile_t] token mask

    # Softmax over the expert (sublane) axis.  Padded token columns in the
    # last tile may hold garbage / produce inf-inf = NaN; every use below is
    # masked with a select, which does not propagate the unselected branch.
    m = jnp.max(logits, axis=0, keepdims=True)            # [1, tile_t]
    ex = jnp.exp(logits - m)                               # [E, tile_t]
    denom = jnp.sum(ex, axis=0, keepdims=True)             # [1, tile_t]
    inv = pl.reciprocal(denom, approx=False)                # [1, tile_t] (exact)
    gates = ex * inv                                        # [E, tile_t]

    # Top-1 expert per token (first max; softmax is monotone so argmax on
    # logits == argmax on gates).  The winning gate value is exp(0)*inv == inv.
    e_iota = jax.lax.broadcasted_iota(jnp.int32, (num_experts, tile_t), 0)
    is_max = logits == m                                    # [E, tile_t]
    top1_idx = jnp.min(jnp.where(is_max, e_iota, num_experts),
                       axis=0, keepdims=True)               # [1, tile_t]
    hit = (e_iota == top1_idx) & valid                      # [E, tile_t]

    # combine_weights tile, already in the PyTorch [E, T] orientation and
    # lane-dense (last dim = tile_t).
    combine_ref[...] = jnp.where(hit, inv, jnp.float32(0.0)).astype(
        combine_ref.dtype)

    # Per-tile partial sums for the auxiliary loss (lane reduces over tokens);
    # finished in the wrapper so the token grid axis stays "parallel".
    gate_sum = jnp.sum(jnp.where(valid, gates, jnp.float32(0.0)), axis=1)  # (E,)
    cnt_sum = jnp.sum(hit.astype(jnp.float32), axis=1)                     # (E,)
    stats_ref[0, 0:1, :] = gate_sum.reshape(1, num_experts)
    stats_ref[0, 1:2, :] = cnt_sum.reshape(1, num_experts)


def top1_gate(x, w, *, tile_t=None, temperature=TEMPERATURE):
    """Top1Gate forward.

    x: [T, D] tokens; w: [E, D] wg.weight (Linear, no bias).
    Returns (l_aux, combine_weights[E, T], None, metadata)."""
    T, D = x.shape
    E, D2 = w.shape
    assert D2 == D

    vmem_cap = _vmem_capacity_bytes()
    usable = (vmem_cap * 13) // 16   # ~52 MiB on v7x, ~104 MiB on v5e/v6e

    if tile_t is None:
        tile_t = _pick_tile_t(T, D, E, x.dtype.itemsize, w.dtype.itemsize, usable)
    else:
        tile_t = max(int(tile_t), 1)
        if tile_t < T and tile_t % 128 != 0:
            # (8,128) constraint on the combine block's last dim when tiled.
            tile_t = _round_up(tile_t, 128)
    if tile_t >= T:
        tile_t = T                    # full-dim block: no divisibility constraint
    num_tiles = pl.cdiv(T, tile_t)

    # One tiny wrapper-side transpose of the gate weight replaces per-tile
    # in-kernel relayout work on the RHS of the matmul.
    wt = jnp.transpose(w)             # [D, E]

    # VMEM footprint matching the tile picker's budget.
    vmem_need = (2 * tile_t * D * x.dtype.itemsize     # double-buffered x tile
                 + 2 * E * D * w.dtype.itemsize        # pipelined (constant) weight
                 + 2 * E * tile_t * 4                  # double-buffered combine tile
                 + 4 * 2 * E * 4                       # stats tiles
                 + (4 << 20))                          # epilogue temporaries
    vmem_limit = int(min(max(vmem_need, 16 << 20), usable))

    kernel = functools.partial(_top1gate_kernel, total_tokens=T,
                               temperature=temperature)

    # Memory-bound kernel: tell XLA bytes >> flops so it schedules around it.
    cost = pl.CostEstimate(
        flops=2 * T * D * E,
        transcendentals=T * E,
        bytes_accessed=(T * D * x.dtype.itemsize + E * D * w.dtype.itemsize
                        + E * T * 4 + num_tiles * 2 * E * 4))

    combine, stats = pl.pallas_call(
        kernel,
        out_shape=(
            jax.ShapeDtypeStruct((E, T), jnp.float32),
            jax.ShapeDtypeStruct((num_tiles, 2, E), jnp.float32),
        ),
        grid_spec=pltpu.PrefetchScalarGridSpec(
            num_scalar_prefetch=0,
            grid=(num_tiles,),
            in_specs=[
                pl.BlockSpec((tile_t, D), lambda i: (i, 0)),   # token tile
                pl.BlockSpec((D, E), lambda i: (0, 0)),        # resident weight
            ],
            out_specs=(
                pl.BlockSpec((E, tile_t), lambda i: (0, i)),   # lane-dense tile
                pl.BlockSpec((1, 2, E), lambda i: (i, 0, 0)),  # partial stats
            ),
        ),
        compiler_params=pltpu.CompilerParams(
            dimension_semantics=("parallel",),
            vmem_limit_bytes=vmem_limit,
        ),
        cost_estimate=cost,
    )(x, wt)

    # Tiny epilogue: finish the aux-loss reduction over tiles.
    gate_sum = jnp.sum(stats[:, 0, :], axis=0)      # [E]
    cnt_sum = jnp.sum(stats[:, 1, :], axis=0)       # [E]
    me = gate_sum / T
    ce = cnt_sum / T
    l_aux = jnp.mean(me * ce) * E * E

    metadata = {}  # TODO(synk): logging histograms (torch.histc) not reproduced
    return l_aux, combine, None, metadata


def _reference(x, w, temperature=TEMPERATURE):
    logits = (x.astype(jnp.float32) @ w.astype(jnp.float32).T) / temperature
    gates = jax.nn.softmax(logits, axis=1)
    T, E = gates.shape
    idx = jnp.argmax(gates, axis=1)
    prob = jnp.max(gates, axis=1)
    combine = jnp.zeros((T, E), jnp.float32).at[jnp.arange(T), idx].set(prob).T
    me = jnp.mean(gates, axis=0)
    ce = jnp.mean(jax.nn.one_hot(idx, E, dtype=jnp.float32), axis=0)
    l_aux = jnp.mean(me * ce) * E * E
    return l_aux, combine


if __name__ == "__main__":
    key = jax.random.PRNGKey(0)

    # Case 1: explicit 128-token tile -> two full tiles, exercises pipelining
    # and the cross-tile stats reduction.
    T, D, E = 256, 256, 8
    kx, kw, key = jax.random.split(key, 3)
    x = jax.random.normal(kx, (T, D), dtype=jnp.float32)
    w = jax.random.normal(kw, (E, D), dtype=jnp.float32) * (1.0 / (D ** 0.5))
    l_aux, combine, dispatch, meta = top1_gate(x, w, tile_t=128)
    jax.block_until_ready((l_aux, combine))
    l_ref, c_ref = _reference(x, w)
    assert combine.shape == (E, T)
    assert jnp.allclose(combine, c_ref, atol=1e-5, rtol=1e-5)
    assert jnp.allclose(l_aux, l_ref, atol=1e-5, rtol=1e-5)
    assert dispatch is None and meta == {}

    # Case 2: auto tile picker + partial last tile (token-mask path).
    T2, D2, E2 = 320, 128, 8
    kx2, kw2, key = jax.random.split(key, 3)
    x2 = jax.random.normal(kx2, (T2, D2), dtype=jnp.float32)
    w2 = jax.random.normal(kw2, (E2, D2), dtype=jnp.float32) * (1.0 / (D2 ** 0.5))
    l_aux2, combine2, dispatch2, meta2 = top1_gate(x2, w2)
    jax.block_until_ready((l_aux2, combine2))
    l_ref2, c_ref2 = _reference(x2, w2)
    assert combine2.shape == (E2, T2)
    assert jnp.allclose(combine2, c_ref2, atol=1e-5, rtol=1e-5)
    assert jnp.allclose(l_aux2, l_ref2, atol=1e-5, rtol=1e-5)
    assert dispatch2 is None and meta2 == {}

    print("KERNEL_OK")
</pallas_src>

<mosaic_0001>
module attributes {stable_mosaic.version = 11 : i64} {
  func.func @_top1gate_kernel(%arg0: i32, %arg1: memref<128x256xf32, #tpu.memory_space<vmem>>, %arg2: memref<256x8xf32, #tpu.memory_space<vmem>>, %arg3: memref<8x128xf32, #tpu.memory_space<vmem>>, %arg4: memref<1x2x8xf32, #tpu.memory_space<vmem>>) attributes {dimension_semantics = [#tpu.dimension_semantics<parallel>], iteration_bounds = array<i64: 2>, scalar_prefetch = 0 : i64, scratch_operands = 0 : i64, tpu.core_type = #tpu.core_type<tc>, window_params = [{transform_indices = @transform_0, window_bounds = array<i64: 128, 256>}, {pipeline_mode = #tpu.pipeline_mode<synchronous>, transform_indices = @transform_1, window_bounds = array<i64: 256, 8>}, {transform_indices = @transform_2, window_bounds = array<i64: 8, 128>}, {transform_indices = @transform_3, window_bounds = array<i64: 1, 2, 8>}]} {
    %c0 = arith.constant 0 : index
    %c0_0 = arith.constant 0 : index
    %0 = vector.load %arg1[%c0, %c0_0] : memref<128x256xf32, #tpu.memory_space<vmem>>, vector<128x256xf32>
    %c0_1 = arith.constant 0 : index
    %c0_2 = arith.constant 0 : index
    %1 = vector.load %arg2[%c0_1, %c0_2] : memref<256x8xf32, #tpu.memory_space<vmem>>, vector<256x8xf32>
    %cst = arith.constant dense<0.000000e+00> : vector<128x8xf32>
    %2 = tpu.matmul %0, %1, %cst {dimension_numbers = #tpu.dot_dimension_numbers<[1], [0], [0], [1], [0, 0, 1, 1], [], []>} : vector<128x256xf32>, vector<256x8xf32>, vector<128x8xf32> -> vector<128x8xf32>
    %3 = tpu.transpose %2, [1, 0] : vector<128x8xf32> -> vector<8x128xf32>
    %c128_i32 = arith.constant 128 : i32
    %4 = arith.muli %arg0, %c128_i32 : i32
    %c256_i32 = arith.constant 256 : i32
    %5 = arith.subi %c256_i32, %4 : i32
    %6 = tpu.iota {dimensions = array<i32: 1>} : vector<1x128xi32>
    %7 = vector.broadcast %5 : i32 to vector<1x128xi32>
    %8 = arith.cmpi slt, %6, %7 : vector<1x128xi32>
    %cst_3 = arith.constant dense<0xFF800000> : vector<128xf32>
    %9 = vector.multi_reduction <maximumf>, %3, %cst_3 [0] : vector<8x128xf32> to vector<128xf32>
    %10 = vector.shape_cast %9 : vector<128xf32> to vector<1x128xf32>
    %11 = vector.broadcast %10 : vector<1x128xf32> to vector<8x128xf32>
    %12 = arith.subf %3, %11 : vector<8x128xf32>
    %13 = math.exp %12 : vector<8x128xf32>
    %cst_4 = arith.constant dense<0.000000e+00> : vector<128xf32>
    %14 = vector.multi_reduction <add>, %13, %cst_4 [0] : vector<8x128xf32> to vector<128xf32>
    %15 = vector.shape_cast %14 : vector<128xf32> to vector<1x128xf32>
    %16 = tpu.reciprocal %15 : vector<1x128xf32> -> vector<1x128xf32>
    %17 = vector.broadcast %16 : vector<1x128xf32> to vector<8x128xf32>
    %18 = arith.mulf %13, %17 : vector<8x128xf32>
    %19 = tpu.iota {dimensions = array<i32: 0>} : vector<8x128xi32>
    %20 = vector.broadcast %10 : vector<1x128xf32> to vector<8x128xf32>
    %21 = arith.cmpf oeq, %3, %20 : vector<8x128xf32>
    %c8_i32 = arith.constant 8 : i32
    %22 = vector.broadcast %c8_i32 : i32 to vector<8x128xi32>
    %23 = arith.select %21, %19, %22 : vector<8x128xi1>, vector<8x128xi32>
    %cst_5 = arith.constant dense<2147483647> : vector<128xi32>
    %24 = vector.multi_reduction <minsi>, %23, %cst_5 [0] : vector<8x128xi32> to vector<128xi32>
    %25 = vector.shape_cast %24 : vector<128xi32> to vector<1x128xi32>
    %26 = vector.broadcast %25 : vector<1x128xi32> to vector<8x128xi32>
    %27 = arith.cmpi eq, %19, %26 : vector<8x128xi32>
    %28 = vector.broadcast %8 : vector<1x128xi1> to vector<8x128xi1>
    %29 = arith.andi %27, %28 : vector<8x128xi1>
    %cst_6 = arith.constant 0.000000e+00 : f32
    %30 = vector.shape_cast %16 : vector<1x128xf32> to vector<1x128xf32>
    %31 = vector.broadcast %30 : vector<1x128xf32> to vector<8x128xf32>
    %32 = vector.broadcast %cst_6 : f32 to vector<8x128xf32>
    %33 = arith.select %29, %31, %32 : vector<8x128xi1>, vector<8x128xf32>
    %c0_7 = arith.constant 0 : index
    %c0_8 = arith.constant 0 : index
    %34 = vector.load %arg3[%c0_7, %c0_8] : memref<8x128xf32, #tpu.memory_space<vmem>>, vector<8x128xf32>
    tpu.vector_store %arg3[%c0_7, %c0_8], %33 {strides = array<i32>} : memref<8x128xf32, #tpu.memory_space<vmem>>, vector<8x128xf32>,
    %cst_9 = arith.constant 0.000000e+00 : f32
    %35 = vector.shape_cast %8 : vector<1x128xi1> to vector<1x128xi1>
    %36 = vector.broadcast %35 : vector<1x128xi1> to vector<8x128xi1>
    %37 = vector.broadcast %cst_9 : f32 to vector<8x128xf32>
    %38 = arith.select %36, %18, %37 : vector<8x128xi1>, vector<8x128xf32>
    %cst_10 = arith.constant dense<0.000000e+00> : vector<8xf32>
    %39 = vector.multi_reduction <add>, %38, %cst_10 [1] : vector<8x128xf32> to vector<8xf32>
    %40 = arith.extui %29 : vector<8x128xi1> to vector<8x128xi32>
    %41 = arith.sitofp %40 : vector<8x128xi32> to vector<8x128xf32>
    %cst_11 = arith.constant dense<0.000000e+00> : vector<8xf32>
    %42 = vector.multi_reduction <add>, %41, %cst_11 [1] : vector<8x128xf32> to vector<8xf32>
    %43 = vector.shape_cast %39 : vector<8xf32> to vector<1x8xf32>
    %c0_12 = arith.constant 0 : index
    %c0_13 = arith.constant 0 : index
    %c0_14 = arith.constant 0 : index
    %44 = vector.load %arg4[%c0_12, %c0_13, %c0_14] : memref<1x2x8xf32, #tpu.memory_space<vmem>>, vector<1x1x8xf32>
    %45 = vector.shape_cast %44 : vector<1x1x8xf32> to vector<1x8xf32>
    %46 = vector.shape_cast %43 : vector<1x8xf32> to vector<1x1x8xf32>
    tpu.vector_store %arg4[%c0_12, %c0_13, %c0_14], %46 {strides = array<i32>} : memref<1x2x8xf32, #tpu.memory_space<vmem>>, vector<1x1x8xf32>,
    %47 = vector.shape_cast %42 : vector<8xf32> to vector<1x8xf32>
    %c0_15 = arith.constant 0 : index
    %c1 = arith.constant 1 : index
    %c0_16 = arith.constant 0 : index
    %48 = vector.load %arg4[%c0_15, %c1, %c0_16] : memref<1x2x8xf32, #tpu.memory_space<vmem>>, vector<1x1x8xf32>
    %49 = vector.shape_cast %48 : vector<1x1x8xf32> to vector<1x8xf32>
    %50 = vector.shape_cast %47 : vector<1x8xf32> to vector<1x1x8xf32>
    tpu.vector_store %arg4[%c0_15, %c1, %c0_16], %50 {strides = array<i32>} : memref<1x2x8xf32, #tpu.memory_space<vmem>>, vector<1x1x8xf32>,
    return
  }
  func.func @transform_0(%arg0: i32) -> (i32, i32) {
    %c0_i32 = arith.constant 0 : i32
    %c0_i32_0 = arith.constant 0 : i32
    return %arg0, %c0_i32 : i32, i32
  }
  func.func @transform_1(%arg0: i32) -> (i32, i32) {
    %c0_i32 = arith.constant 0 : i32
    %c0_i32_0 = arith.constant 0 : i32
    %c0_i32_1 = arith.constant 0 : i32
    return %c0_i32, %c0_i32_0 : i32, i32
  }
  func.func @transform_2(%arg0: i32) -> (i32, i32) {
    %c0_i32 = arith.constant 0 : i32
    %c0_i32_0 = arith.constant 0 : i32
    return %c0_i32, %arg0 : i32, i32
  }
  func.func @transform_3(%arg0: i32) -> (i32, i32, i32) {
    %c0_i32 = arith.constant 0 : i32
    %c0_i32_0 = arith.constant 0 : i32
    %c0_i32_1 = arith.constant 0 : i32
    return %arg0, %c0_i32, %c0_i32_0 : i32, i32, i32
  }
}

</mosaic_0001>

<bundles_post_ra>
// kernel: tpu_custom_call.1
= control target key start
LH: loop header
LB: loop body
LE: loop exit
PB: predicated region body
PF: predicated region fallthrough
CT: control target
= control target key end

     0   :  { %9 = vsyncpa [#allocation3], 0  ;;  %s1325_s0 = inlined_call_operand.hbm [shape: f32[256,256], index: 0, kind: input, shape index: {}]   ;;  %s1326_s1 = inlined_call_operand.vmem [shape: f32[256,8], index: 1, kind: input, shape index: {}]   ;;  %s1327_s2 = inlined_call_operand.hbm [shape: f32[8,256], index: 2, kind: output, shape index: {0}]   ;;  %s1328_s3 = inlined_call_operand.hbm [shape: f32[2,2,8], index: 3, kind: output, shape index: {1}]  }
   0x1   :  { %11 = vsyncpa [#allocation3 + $0x1], 0 }
   0x2   :  { %12 = vsyncpa [#allocation4], 0 }
   0x3   :  { %14 = vsyncpa [#allocation4 + $0x1], 0 }
   0x4   :  { %15 = vsyncpa [#allocation7], 0 }
   0x5   :  { %17 = vsyncpa [#allocation7 + $0x1], 0  ;;  %s1004_s12 = smov 0   ;;  %s1006_s13 = smov 0  }
   0x6   :  { %s1008_s14 = smov 0   ;;  %s1010_s15 = smov 0  }
   0x7 LB: > { %s1025_s16 = sadd.s32 4294967295, %s976_s15   ;;  %s641_s17 = sadd.s32 4294967294, %s976_s15   ;;  %s976_s15 = sphi %s1010_s15, %s1341_s15   ;;  %s972_s14 = sphi %s1008_s14, %s1340_s14   ;;  %s968_s13 = sphi %s1006_s13, %s1339_s13   ;;  %s964_s12 = sphi %s1004_s12, %s1338_s12  }
   0x8   : > { %s1029_s18 = sadd.s32 1, %s976_s15   ;;  %s30_s19 = sadd.s32 1, %s972_s14 }
   0x9   : > { %s27_s20 = ssub.s32 %s976_s15, %s1029_s18  ;;  %p37_p0 = scmp.ne.s32.totalorder %s972_s14, %s968_s13 }
   0xa   : > { %p28_p1 = scmp.eq.s32.totalorder %s27_s20, 0  ;;  %p38_p2 = scmp.eq.s32.totalorder %s976_s15, 0 }
   0xb   : > { %p43_p3 = scmp.ne.s32.totalorder %s968_s13, %s964_s12  ;;  %p44_p4 = scmp.eq.s32.totalorder %s1025_s16, 0 }
   0xc   : > { %s1041_s21 = scalar_select %p28_p1, %s972_s14, %s30_s19  }
   0xd   : > { %p1043_p5 = por %p38_p2, %p37_p0  ;;  %p1047_p6 = por %p44_p4, %p43_p3 }
   0xe   : > { %p88_p7 = scmp.eq.s32.totalorder %s1025_s16, 1  ;;  %p94_p8 = scmp.eq.s32.totalorder %s641_s17, 1 }
   0xf   : > { %p807_p10 = scmp.lt.s32.totalorder %s976_s15, 2  ;;  %s143_s26 = sand.u32 1, %s972_s14  }
  0x10   : > { %p1054_p11 = por %p88_p7, %p37_p0  ;;  %p1058_p12 = por %p94_p8, %p43_p3 }
  0x11   : > { %s661_s27 = sshll.u32 %s976_s15, 12  ;;  %s644_s28 = sshll.u32 %s143_s26, 8 }
  0x12   : > { %s1332_s24 = scalar_select %p1054_p11, 1, 0 }
  0x13   : > { %s1333_s25 = scalar_select %p1058_p12, 1, 0 }
  0x14   : > { %s1067_s4 = scalar_lea.hbm %s1325_s0, %s661_s27  ;;  %s147_s5 = scalar_lea.vmem [#allocation2], %s644_s28 }
  0x15   : > { %s155_s6 = sshll.u32 %s147_s5, 4  ;;  %p1071_p13 = pnand %p807_p10, %p1043_p5  ;;  %s1075_s6 = int_to_ptr.vmem [resolvable:$true] %s155_s6 }
  0x16   : > { %s1077_s8 = scalar_lea.sflag [#allocation3], %s143_s26  ;;  %s848_s9 = scalar_lea.hbm %s1067_s4, 4096 }
  0x17   : > { %p849_p0 = scmp.ne.s32.totalorder %s1067_s4, %s848_s9  ;;  %p850_p1 = pneg %p1071_p13 }
  0x18   : > { %s853_s17 = scalar_lea.hbm %s1325_s0, 8192  ;;  %p854_p4 = scmp.lt.u32.totalorder %s1067_s4, %s1325_s0 }
  0x19   : > { %p851_p2 = pnand %p850_p1, %p849_p0  ;;  %p855_p5 = scmp.lt.u32.totalorder %s853_s17, %s848_s9 }
  0x1a   : > { %p857_p8 = scmp.lt.u32.totalorder %s848_s9, %s1067_s4 }
  0x1b   : > { %p852_p3 = pneg %p851_p2  ;;  %p856_p7 = por %p855_p5, %p854_p4 }
  0x1d   : > { %p858_p10 = por %p857_p8, %p856_p7 }
  0x1f   : > { %p859_p9 = pnand %p858_p10, %p852_p3 }
  0x21   : > { %862 = shalt.err (!%p859_p9)
}
  0x22   : > { %s863_s22 = scalar_lea.vmem %s1075_s6, 4096  ;;  %s978_s26 = smov [#allocation2]  }
  0x23   : > { %p864_p0 = scmp.ne.s32.totalorder %s1075_s6, %s863_s22  ;;  %s868_s27 = sshll.u32 %s978_s26, 4  ;;  %s869_s27 = int_to_ptr.vmem [resolvable:$false] %s868_s27 }
  0x24   : > { %s870_s28 = scalar_lea.vmem %s869_s27, 8192  ;;  %p871_p11 = scmp.lt.s32.totalorder %s1075_s6, %s869_s27 }
  0x25   : > { %p866_p2 = pnand %p864_p0, %p850_p1  ;;  %p872_p4 = scmp.lt.s32.totalorder %s870_s28, %s863_s22 }
  0x27   : > { %p867_p12 = pneg %p866_p2  ;;  %p873_p5 = por %p872_p4, %p871_p11 }
  0x29   : > { %p874_p7 = pnand %p873_p5, %p867_p12 }
  0x2b   : > { %877 = shalt.err (!%p874_p7)
}
  0x2c   : > { %s979_s29 = smov 256   ;;  %s980_s30 = smov 16  }
  0x2d   : > { %799 = dma.hbm_to_vmem [thread:$0]  (!%p1071_p13), %s1067_s4, 4096, %s1075_s6, %s1077_s8, %s979_s29, %s979_s29, %s980_s30  }
  0x2e   : > { %p648_p9 = scmp.ge.s32.totalorder %s976_s15, 1  ;;  %p163_p1 = scmp.lt.s32.totalorder %s976_s15, 3 }
  0x30   : > { %p164_p3 = pnand %p648_p9, %p163_p1 }
  0x31   : > { %s1108_s5 = sand.u32 (!%p164_p3), 1, %s968_s13  }
  0x32   : > { %167 = sbr.rel (%p164_p3) target bundleno = 652 (0x28c), region = 28  ;;  %s649_s9 = sshll.u32 (!%p164_p3), %s1108_s5, 8 }
  0x33   : > { %s170_s10 = scalar_lea.sflag (!%p164_p3), [#allocation3], %s1108_s5  ;;  %s1112_s11 = scalar_lea.vmem (!%p164_p3), [#allocation2], %s649_s9 }
  0x39   : > { %951 = dma.done.wait (%p1047_p6), %s170_s10, 4096  }
  0x3a   : > { %953 = vsyncadd (%p1047_p6), %s170_s10, 4294963200  ;;  %v250_v0 = vld [vmem:[%s1326_s1 + $0x80] sm:$0xff]  ;;  %v251_v1 = vld [vmem:[%s1326_s1 + $0x88] sm:$0xff]  ;;  %s650_s6 = sshll.u32 %s1108_s5, 3  ;;  %s508_s22 = scalar_lea.sflag [#allocation4], %s1108_s5 }
  0x3b   : > { %v234_v2 = vld [vmem:[%s1326_s1] sm:$0xff]  ;;  %v742_v3 = vpack.c.bf16 %v251_v1, %v250_v0  ;;  %v235_v4 = vld [vmem:[%s1326_s1 + $0x8] sm:$0xff]  ;;  %v252_v5 = vld [vmem:[%s1326_s1 + $0x90] sm:$0xff]  ;;  %s193_s7 = scalar_lea.vmem [#allocation5], %s650_s6  ;;  %p1335_p11 = scmp.ne.s32.totalorder %s1332_s24, 0 }
  0x3c   : > { %v253_v6 = vld [vmem:[%s1326_s1 + $0x98] sm:$0xff]  ;;  %v744_v7 = vpack.c.bf16 %v235_v4, %v234_v2  ;;  %v236_v9 = vld [vmem:[%s1326_s1 + $0x10] sm:$0xff]  ;;  %v254_v11 = vld [vmem:[%s1326_s1 + $0xa0] sm:$0xff]  ;;  %s526_s20 = sshll.u32 %s193_s7, 4  ;;  %s982_s23 = smov [#allocation5]   ;;  %s527_s20 = int_to_ptr.vmem [resolvable:$true] %s526_s20 }
  0x3d   : > { %v746_v8 = vpack.c.bf16 %v253_v6, %v252_v5  ;;  %v237_v10 = vld [vmem:[%s1326_s1 + $0x18] sm:$0xff]  ;;  %743 = vmatprep.subr.bf16.mxu0 %v742_v3  ;;  %v255_v12 = vld [vmem:[%s1326_s1 + $0xa8] sm:$0xff]  ;;  %774 = vmatprep.subr.bf16.mxu1 %v742_v3  ;;  %v238_v15 = vld [vmem:[%s1326_s1 + $0x20] sm:$0xff]  ;;  %s878_s26 = scalar_lea.vmem %s527_s20, 128  ;;  %s882_s27 = sshll.u32 %s982_s23, 4  ;;  %s883_s27 = int_to_ptr.vmem [resolvable:$false] %s882_s27 }
  0x3e   : > { %745 = vmatpush3.bf16.msra.mxu0 %v744_v7  ;;  %v748_v13 = vpack.c.bf16 %v237_v10, %v236_v9  ;;  %782 = vmatpush3.bf16.msra.mxu1 %v744_v7  ;;  %v750_v14 = vpack.c.bf16 %v255_v12, %v254_v11  ;;  %v239_v16 = vld [vmem:[%s1326_s1 + $0x28] sm:$0xff]  ;;  %v256_v17 = vld [vmem:[%s1326_s1 + $0xb0] sm:$0xff]  ;;  %v257_v18 = vld [vmem:[%s1326_s1 + $0xb8] sm:$0xff]  ;;  %p879_p6 = scmp.ne.s32.totalorder %s527_s20, %s878_s26  ;;  %s884_s28 = scalar_lea.vmem %s883_s27, 256 }
  0x3f   : > { %747 = vmatprep.subr.bf16.mxu0 %v746_v8  ;;  %775 = vmatprep.subr.bf16.mxu1 %v746_v8  ;;  %v752_v19 = vpack.c.bf16 %v239_v16, %v238_v15  ;;  %v754_v20 = vpack.c.bf16 %v257_v18, %v256_v17  ;;  %v240_v21 = vld [vmem:[%s1326_s1 + $0x30] sm:$0xff]  ;;  %v241_v22 = vld [vmem:[%s1326_s1 + $0x38] sm:$0xff]  ;;  %v258_v23 = vld [vmem:[%s1326_s1 + $0xc0] sm:$0xff]  ;;  %p885_p8 = scmp.lt.s32.totalorder %s527_s20, %s883_s27  ;;  %p886_p10 = scmp.lt.s32.totalorder %s884_s28, %s878_s26 }
  0x40   : > { %v259_v24 = vld [vmem:[%s1326_s1 + $0xc8] sm:$0xff]  ;;  %v756_v26 = vpack.c.bf16 %v241_v22, %v240_v21  ;;  %v242_v28 = vld [vmem:[%s1326_s1 + $0x40] sm:$0xff]  ;;  %v260_v30 = vld [vmem:[%s1326_s1 + $0xd0] sm:$0xff]  ;;  %p880_p12 = pnand %p879_p6, %p1335_p11 }
  0x41   : > { %v203_v25 = vld [vmem:[%s1112_s11 + $0x8] sm:$0xff]  ;;  %v758_v27 = vpack.c.bf16 %v259_v24, %v258_v23  ;;  %v261_v31 = vld [vmem:[%s1326_s1 + $0xd8] sm:$0xff]  ;;  %v244_v35 = vld [vmem:[%s1326_s1 + $0x50] sm:$0xff]  ;;  %p887_p0 = por %p886_p10, %p885_p8 }
  0x42   : > { %749 = vmatpush3.bf16.msra.mxu0 %v748_v13  ;;  %783 = vmatpush3.bf16.msra.mxu1 %v748_v13  ;;  %v243_v29 = vld [vmem:[%s1326_s1 + $0x48] sm:$0xff]  ;;  %v762_v34 = vpack.c.bf16 %v261_v31, %v260_v30  ;;  %v245_v36 = vld [vmem:[%s1326_s1 + $0x58] sm:$0xff]  ;;  %v262_v37 = vld [vmem:[%s1326_s1 + $0xe0] sm:$0xff]  ;;  %p881_p13 = pneg %p880_p12 }
  0x43   : > { %751 = vmatprep.subr.bf16.mxu0 %v750_v14  ;;  %776 = vmatprep.subr.bf16.mxu1 %v750_v14  ;;  %v760_v32 = vpack.c.bf16 %v243_v29, %v242_v28  ;;  %v219_v33 = vld [vmem:[%s1112_s11 + $0x88] sm:$0xff]  ;;  %v764_v39 = vpack.c.bf16 %v245_v36, %v244_v35  ;;  %v246_v41 = vld [vmem:[%s1326_s1 + $0x60] sm:$0xff]  ;;  %v264_v43 = vld [vmem:[%s1326_s1 + $0xf0] sm:$0xff] }
  0x44   : > { %330 = vmatprep.mubr.f32.mxu0 %v203_v25  ;;  %v263_v38 = vld [vmem:[%s1326_s1 + $0xe8] sm:$0xff]  ;;  %370 = vmatprep.mubr.f32.mxu1 %v219_v33  ;;  %v265_v44 = vld [vmem:[%s1326_s1 + $0xf8] sm:$0xff]  ;;  %v248_v47 = vld [vmem:[%s1326_s1 + $0x70] sm:$0xff]  ;;  %p888_p2 = pnand %p887_p0, %p881_p13 }
  0x45   : > { %v766_v40 = vpack.c.bf16 %v263_v38, %v262_v37  ;;  %v247_v42 = vld [vmem:[%s1326_s1 + $0x68] sm:$0xff]  ;;  %v770_v46 = vpack.c.bf16 %v265_v44, %v264_v43  ;;  %v249_v48 = vld [vmem:[%s1326_s1 + $0x78] sm:$0xff]  ;;  %v202_v50 = vld [vmem:[%s1112_s11] sm:$0xff] }
  0x46   : > { %753 = vmatpush3.bf16.msra.mxu0 %v752_v19  ;;  %784 = vmatpush3.bf16.msra.mxu1 %v752_v19  ;;  %v768_v45 = vpack.c.bf16 %v247_v42, %v246_v41  ;;  %v772_v49 = vpack.c.bf16 %v249_v48, %v248_v47  ;;  %v218_v51 = vld [vmem:[%s1112_s11 + $0x80] sm:$0xff]  ;;  %v205_v52 = vld [vmem:[%s1112_s11 + $0x18] sm:$0xff]  ;;  %v204_v54 = vld [vmem:[%s1112_s11 + $0x10] sm:$0xff] }
  0x47   : > { %755 = vmatprep.subr.bf16.mxu0 %v754_v20  ;;  %777 = vmatprep.subr.bf16.mxu1 %v754_v20  ;;  %v221_v53 = vld [vmem:[%s1112_s11 + $0x98] sm:$0xff]  ;;  %v220_v55 = vld [vmem:[%s1112_s11 + $0x90] sm:$0xff]  ;;  %v207_v56 = vld [vmem:[%s1112_s11 + $0x28] sm:$0xff] }
  0x48   : > { %v223_v57 = vld [vmem:[%s1112_s11 + $0xa8] sm:$0xff]  ;;  %v206_v58 = vld [vmem:[%s1112_s11 + $0x20] sm:$0xff]  ;;  %v209_v60 = vld [vmem:[%s1112_s11 + $0x38] sm:$0xff] }
  0x49   : > { %v222_v59 = vld [vmem:[%s1112_s11 + $0xa0] sm:$0xff]  ;;  %v225_v61 = vld [vmem:[%s1112_s11 + $0xb8] sm:$0xff]  ;;  %v208_v62 = vld [vmem:[%s1112_s11 + $0x30] sm:$0xff] }
  0x4a   : > { %757 = vmatpush3.bf16.msra.mxu0 %v756_v26  ;;  %785 = vmatpush3.bf16.msra.mxu1 %v756_v26  ;;  %v224_v63 = vld [vmem:[%s1112_s11 + $0xb0] sm:$0xff]  ;;  %v211_v0 = vld [vmem:[%s1112_s11 + $0x48] sm:$0xff]  ;;  %v210_v2 = vld [vmem:[%s1112_s11 + $0x40] sm:$0xff] }
  0x4b   : > { %759 = vmatprep.subr.bf16.mxu0 %v758_v27  ;;  %778 = vmatprep.subr.bf16.mxu1 %v758_v27  ;;  %v227_v1 = vld [vmem:[%s1112_s11 + $0xc8] sm:$0xff]  ;;  %v226_v3 = vld [vmem:[%s1112_s11 + $0xc0] sm:$0xff]  ;;  %v213_v4 = vld [vmem:[%s1112_s11 + $0x58] sm:$0xff] }
  0x4c   : > { %v229_v5 = vld [vmem:[%s1112_s11 + $0xd8] sm:$0xff]  ;;  %v212_v6 = vld [vmem:[%s1112_s11 + $0x50] sm:$0xff]  ;;  %v215_v8 = vld [vmem:[%s1112_s11 + $0x68] sm:$0xff] }
  0x4d   : > { %v228_v7 = vld [vmem:[%s1112_s11 + $0xd0] sm:$0xff]  ;;  %v231_v9 = vld [vmem:[%s1112_s11 + $0xe8] sm:$0xff]  ;;  %v214_v10 = vld [vmem:[%s1112_s11 + $0x60] sm:$0xff] }
  0x4e   : > { %761 = vmatpush3.bf16.msra.mxu0 %v760_v32  ;;  %786 = vmatpush3.bf16.msra.mxu1 %v760_v32  ;;  %v230_v11 = vld [vmem:[%s1112_s11 + $0xe0] sm:$0xff]  ;;  %v217_v12 = vld [vmem:[%s1112_s11 + $0x78] sm:$0xff]  ;;  %v216_v14 = vld [vmem:[%s1112_s11 + $0x70] sm:$0xff] }
  0x4f   : > { %763 = vmatprep.subr.bf16.mxu0 %v762_v34  ;;  %779 = vmatprep.subr.bf16.mxu1 %v762_v34  ;;  %v233_v13 = vld [vmem:[%s1112_s11 + $0xf8] sm:$0xff]  ;;  %v232_v15 = vld [vmem:[%s1112_s11 + $0xf0] sm:$0xff]  ;;  %s652_s11 = sshll.u32 %s1025_s16, 7 }
  0x50   : > { %s444_s4 = ssub.s32 256, %s652_s11  ;;  %s1255_s19 = scalar_lea.hbm %s1327_s2, %s652_s11 }
  0x52   : > { %765 = vmatpush3.bf16.msra.mxu0 %v764_v39  ;;  %787 = vmatpush3.bf16.msra.mxu1 %v764_v39 }
  0x53   : > { %767 = vmatprep.subr.bf16.mxu0 %v766_v40  ;;  %780 = vmatprep.subr.bf16.mxu1 %v766_v40 }
  0x56   : > { %769 = vmatpush3.bf16.msra.mxu0 %v768_v45  ;;  %788 = vmatpush3.bf16.msra.mxu1 %v768_v45 }
  0x57   : > { %771 = vmatprep.subr.bf16.mxu0 %v770_v46  ;;  %781 = vmatprep.subr.bf16.mxu1 %v770_v46 }
  0x5a   : > { %773 = vmatpush3.bf16.msra.mxu0 %v772_v49  ;;  %789 = vmatpush3.bf16.msra.mxu1 %v772_v49 }
  0x5d   : > { %331 = vmatmul.mubr.f32.vlgmr.msra.gmra.mrb[0].mxu0 %v202_v50  ;;  %371 = vmatmul.mubr.f32.vlgmr.msra.gmra.mrb[0].mxu1 %v218_v51 }
  0x5e   : > { %335 = vmatprep.mubr.f32.mxu0 %v205_v52  ;;  %375 = vmatprep.mubr.f32.mxu1 %v221_v53 }
  0x61   : > { %336 = vmatmul.mubr.f32.gmra.mrb[2].mxu0 %v204_v54  ;;  %376 = vmatmul.mubr.f32.gmra.mrb[2].mxu1 %v220_v55 }
  0x62   : > { %340 = vmatprep.mubr.f32.mxu0 %v207_v56  ;;  %380 = vmatprep.mubr.f32.mxu1 %v223_v57 }
  0x65   : > { %341 = vmatmul.mubr.f32.gmra.mrb[4].mxu0 %v206_v58  ;;  %381 = vmatmul.mubr.f32.gmra.mrb[4].mxu1 %v222_v59 }
  0x66   : > { %345 = vmatprep.mubr.f32.mxu0 %v209_v60  ;;  %385 = vmatprep.mubr.f32.mxu1 %v225_v61 }
  0x69   : > { %346 = vmatmul.mubr.f32.gmra.mrb[6].mxu0 %v208_v62  ;;  %386 = vmatmul.mubr.f32.gmra.mrb[6].mxu1 %v224_v63 }
  0x6a   : > { %350 = vmatprep.mubr.f32.mxu0 %v211_v0  ;;  %390 = vmatprep.mubr.f32.mxu1 %v227_v1 }
  0x6d   : > { %351 = vmatmul.mubr.f32.gmra.mrb[8].mxu0 %v210_v2  ;;  %391 = vmatmul.mubr.f32.gmra.mrb[8].mxu1 %v226_v3 }
  0x6e   : > { %355 = vmatprep.mubr.f32.mxu0 %v213_v4  ;;  %395 = vmatprep.mubr.f32.mxu1 %v229_v5  ;;  %v445_v4 = vlaneseq }
  0x71   : > { %356 = vmatmul.mubr.f32.gmra.mrb[10].mxu0 %v212_v6  ;;  %396 = vmatmul.mubr.f32.gmra.mrb[10].mxu1 %v228_v7  ;;  %v1246_v7 = vshrl.u32 %v445_v4, 7 }
  0x72   : > { %360 = vmatprep.mubr.f32.mxu0 %v215_v8  ;;  %400 = vmatprep.mubr.f32.mxu1 %v231_v9 }
  0x75   : > { %361 = vmatmul.mubr.f32.gmra.mrb[12].mxu0 %v214_v10  ;;  %401 = vmatmul.mubr.f32.gmra.mrb[12].mxu1 %v230_v11 }
  0x76   : > { %365 = vmatprep.mubr.f32.mxu0 %v217_v12  ;;  %405 = vmatprep.mubr.f32.mxu1 %v233_v13 }
  0x79   : > { %366 = vmatmul.mubr.f32.gmra.mrb[14].mxu0 %v216_v14  ;;  %406 = vmatmul.mubr.f32.gmra.mrb[14].mxu1 %v232_v15 }
 0x130   : > { %v694_v16 = vpop.f32.mrb[0].mxu0  ;;  %v718_v17 = vpop.f32.mrb[0].mxu1 }
 0x131   : > { %v695_v18 = vpop.f32.mrb[1].mxu0  ;;  %v719_v19 = vpop.f32.mrb[1].mxu1 }
 0x132   : > { %v696_v20 = vadd.f32 %v695_v18, %v694_v16  ;;  %v720_v21 = vadd.f32 %v719_v19, %v718_v17 }
 0x134   : > { %v697_v22 = vpop.f32.mrb[2].mxu0  ;;  %411 = vxpose.xlu0.b32.start [1/16] (narrow) %v696_v20, 8  ;;  %v721_v23 = vpop.f32.mrb[2].mxu1 }
 0x135   : > { %v698_v24 = vpop.f32.mrb[3].mxu0  ;;  %v722_v25 = vpop.f32.mrb[3].mxu1 }
 0x136   : > { %v699_v26 = vadd.f32 %v698_v24, %v697_v22  ;;  %v723_v27 = vadd.f32 %v722_v25, %v721_v23  ;;  %v446_v24 = vand.u32 127, %v445_v4  ;;  %v447_v25 = vstv %s444_s4 }
 0x138   : > { %v700_v28 = vpop.f32.mrb[4].mxu0  ;;  %412 = vxpose.xlu0.b32.cont [2/16] (narrow) %v699_v26, 8  ;;  %v724_v29 = vpop.f32.mrb[4].mxu1  ;;  %vm448_vm4 = vcmp.lt.s32.totalorder %v446_v24, %v447_v25 }
 0x139   : > { %v701_v30 = vpop.f32.mrb[5].mxu0  ;;  %v725_v31 = vpop.f32.mrb[5].mxu1 }
 0x13a   : > { %v702_v32 = vadd.f32 %v701_v30, %v700_v28  ;;  %v726_v33 = vadd.f32 %v725_v31, %v724_v29  ;;  %v981_v31 = vmov 0.0  }
 0x13c   : > { %v703_v34 = vpop.f32.mrb[6].mxu0  ;;  %413 = vxpose.xlu0.b32.cont [3/16] (narrow) %v702_v32, 8  ;;  %v727_v35 = vpop.f32.mrb[6].mxu1 }
 0x13d   : > { %v704_v36 = vpop.f32.mrb[7].mxu0  ;;  %v728_v37 = vpop.f32.mrb[7].mxu1 }
 0x13e   : > { %v705_v38 = vadd.f32 %v704_v36, %v703_v34  ;;  %v729_v39 = vadd.f32 %v728_v37, %v727_v35 }
 0x140   : > { %v706_v40 = vpop.f32.mrb[8].mxu0  ;;  %414 = vxpose.xlu0.b32.cont [4/16] (narrow) %v705_v38, 8  ;;  %v730_v41 = vpop.f32.mrb[8].mxu1 }
 0x141   : > { %v707_v42 = vpop.f32.mrb[9].mxu0  ;;  %v731_v43 = vpop.f32.mrb[9].mxu1 }
 0x142   : > { %v708_v44 = vadd.f32 %v707_v42, %v706_v40  ;;  %v732_v45 = vadd.f32 %v731_v43, %v730_v41 }
 0x144   : > { %v709_v46 = vpop.f32.mrb[10].mxu0  ;;  %415 = vxpose.xlu0.b32.cont [5/16] (narrow) %v708_v44, 8  ;;  %v733_v47 = vpop.f32.mrb[10].mxu1 }
 0x145   : > { %v710_v48 = vpop.f32.mrb[11].mxu0  ;;  %v734_v49 = vpop.f32.mrb[11].mxu1 }
 0x146   : > { %v711_v50 = vadd.f32 %v710_v48, %v709_v46  ;;  %v735_v51 = vadd.f32 %v734_v49, %v733_v47 }
 0x148   : > { %v712_v52 = vpop.f32.mrb[12].mxu0  ;;  %416 = vxpose.xlu0.b32.cont [6/16] (narrow) %v711_v50, 8  ;;  %v736_v53 = vpop.f32.mrb[12].mxu1 }
 0x149   : > { %v713_v54 = vpop.f32.mrb[13].mxu0  ;;  %v737_v55 = vpop.f32.mrb[13].mxu1 }
 0x14a   : > { %v714_v56 = vadd.f32 %v713_v54, %v712_v52  ;;  %v738_v57 = vadd.f32 %v737_v55, %v736_v53 }
 0x14c   : > { %v715_v58 = vpop.f32.mrb[14].mxu0  ;;  %417 = vxpose.xlu0.b32.cont [7/16] (narrow) %v714_v56, 8  ;;  %v739_v59 = vpop.f32.mrb[14].mxu1 }
 0x14d   : > { %v716_v60 = vpop.f32.mrb[15].mxu0  ;;  %v740_v61 = vpop.f32.mrb[15].mxu1 }
 0x14e   : > { %v717_v62 = vadd.f32 %v716_v60, %v715_v58  ;;  %v741_v63 = vadd.f32 %v740_v61, %v739_v59 }
 0x150   : > { %418 = vxpose.xlu0.b32.cont [8/16] (narrow) %v717_v62, 8 }
 0x154   : > { %419 = vxpose.xlu0.b32.cont [9/16] (narrow) %v720_v21, 8 }
 0x158   : > { %420 = vxpose.xlu0.b32.cont [10/16] (narrow) %v723_v27, 8 }
 0x15c   : > { %421 = vxpose.xlu0.b32.cont [11/16] (narrow) %v726_v33, 8 }
 0x160   : > { %422 = vxpose.xlu0.b32.cont [12/16] (narrow) %v729_v39, 8 }
 0x164   : > { %423 = vxpose.xlu0.b32.cont [13/16] (narrow) %v732_v45, 8 }
 0x168   : > { %424 = vxpose.xlu0.b32.cont [14/16] (narrow) %v735_v51, 8 }
 0x16c   : > { %425 = vxpose.xlu0.b32.cont [15/16] (narrow) %v738_v57, 8 }
 0x170   : > { %426 = vxpose.xlu0.b32.end [16/16] (narrow) %v741_v63, 8 }
 0x1b4   : > { %v427_v0 = vpop.trf.xlu0 }
 0x1b5   : > { %v449_v1 = vrot.slane %v427_v0, 4 }
 0x1b7   : > { %v450_v2 = vmax.f32 %v427_v0, %v449_v1 }
 0x1b9   : > { %v451_v3 = vrot.slane %v450_v2, 2 }
 0x1bb   : > { %v452_v5 = vmax.f32 %v450_v2, %v451_v3 }
 0x1bd   : > { %v453_v6 = vrot.slane %v452_v5, 1 }
 0x1bf   : > { %v454_v8 = vmax.f32 %v452_v5, %v453_v6 }
 0x1c1   : > { %v455_v9 = vsub.f32 %v427_v0, %v454_v8  ;;  %vm468_vm0 = vcmp.eq.f32.partialorder %v427_v0, %v454_v8 }
 0x1c2   : > { %v469_v10 = vsel %vm468_vm0, %v1246_v7, 8 }
 0x1c3   : > { %v456_v11 = vmul.f32 1.442695, %v455_v9  ;;  %v470_v12 = vrot.slane %v469_v10, 4 }
 0x1c5   : > { %844 = vpow2.f32 %v456_v11  ;;  %vm471_vm1 = vcmp.lt.s32.totalorder %v469_v10, %v470_v12 }
 0x1c6   : > { %v472_v13 = vsel %vm471_vm1, %v469_v10, %v470_v12 }
 0x1c7   : > { %v473_v15 = vrot.slane %v472_v13, 2 }
 0x1c9   : > { %vm474_vm2 = vcmp.lt.s32.totalorder %v472_v13, %v473_v15 }
 0x1ca   : > { %v475_v20 = vsel %vm474_vm2, %v472_v13, %v473_v15 }
 0x1cb   : > { %v476_v22 = vrot.slane %v475_v20, 1 }
 0x1cd   : > { %vm477_vm3 = vcmp.lt.s32.totalorder %v475_v20, %v476_v22 }
 0x1ce   : > { %v478_v26 = vsel %vm477_vm3, %v475_v20, %v476_v22 }
 0x1cf   : > { %v845_v14 = vpop.eup %844  ;;  %vm479_vm5 = vcmp.eq.s32.totalorder %v1246_v7, %v478_v26 }
 0x1d0   : > { %v458_v16 = vrot.slane %v845_v14, 4  ;;  %vm482_vm6 = vmand %vm479_vm5, %vm448_vm4 }
 0x1d1   : > { %v653_v32 = vsel %vm482_vm6, 1.0, %v981_v31 }
 0x1d2   : > { %v459_v17 = vadd.f32 %v845_v14, %v458_v16 }
 0x1d4   : > { %v460_v18 = vrot.slane %v459_v17, 2 }
 0x1d6   : > { %v461_v19 = vadd.f32 %v460_v18, %v459_v17 }
 0x1d8   : > { %v462_v21 = vrot.slane %v461_v19, 1 }
 0x1da   : > { %v463_v23 = vadd.f32 %v462_v21, %v461_v19 }
 0x1dc   : > { %846 = vrcp.f32 %v463_v23 }
 0x1e6   : > { %v847_v27 = vpop.eup %846 }
 0x1e7   : > { %v465_v28 = vmul.f32 %v847_v27, %v845_v14  ;;  %v483_v29 = vsel %vm482_vm6, %v847_v27, 0.0 }
 0x1e8   : > { %484 = vst [vmem:[%s193_s7] sm:$0xff] %v483_v29 }
 0x1e9   : > { %v485_v30 = vsel %vm448_vm4, %v465_v28, 0.0 }
 0x1ea   : > { %486 = vadd.xlane.f32.xlu1 %v485_v30 }
 0x1ee   : > { %490 = vadd.xlane.f32.xlu1 %v653_v32 }
 0x1ef   : > { %891 = shalt.err (!%p888_p2)
}
 0x1f0   : > { %s892_s29 = scalar_lea.hbm %s1255_s19, 128  ;;  %s896_s10 = scalar_lea.hbm %s1327_s2, 256 }
 0x1f1   : > { %p893_p4 = scmp.ne.s32.totalorder %s1255_s19, %s892_s29  ;;  %p897_p9 = scmp.lt.u32.totalorder %s1255_s19, %s1327_s2 }
 0x1f2   : > { %p898_p1 = scmp.lt.u32.totalorder %s896_s10, %s892_s29  ;;  %p900_p6 = scmp.lt.u32.totalorder %s892_s29, %s1255_s19 }
 0x1f3   : > { %p894_p5 = pnand %p893_p4, %p1335_p11 }
 0x1f4   : > { %p899_p3 = por %p898_p1, %p897_p9 }
 0x1f5   : > { %p895_p7 = pneg %p894_p5 }
 0x1f6   : > { %p901_p12 = por %p900_p6, %p899_p3 }
 0x1f8   : > { %p902_p13 = pnand %p901_p12, %p895_p7 }
 0x1fa   : > { %905 = shalt.err (!%p902_p13)
}
 0x1fb   : > { %792 = dma.vmem_to_hbm [thread:$0]  (%p1335_p11), %s527_s20, 128, %s1255_s19, %s508_s22   ;;  %v495_v33 = vsub.s32 %v446_v24, %v1246_v7  ;;  %vm498_vm7 = vcmask 57344  }
 0x1fc   : > { %s651_s6 = sshll.u32 %s1108_s5, 1  ;;  %s657_s7 = sshll.u32 %s1025_s16, 5 }
 0x1fd   : > { %s200_s8 = scalar_lea.vmem [#allocation6], %s651_s6  ;;  %s1281_s27 = scalar_lea.hbm %s1328_s3, %s657_s7 }
 0x1fe   : > { %s539_s17 = sshll.u32 %s200_s8, 4  ;;  %s513_s19 = scalar_lea.sflag [#allocation7], %s1108_s5  ;;  %s1283_s17 = int_to_ptr.vmem [resolvable:$true] %s539_s17 }
 0x1ff   : > { %s906_s20 = scalar_lea.vmem %s1283_s17, 32  ;;  %s983_s16 = smov [#allocation6]  }
 0x200   : > { %p907_p8 = scmp.ne.s32.totalorder %s1283_s17, %s906_s20  ;;  %s910_s22 = sshll.u32 %s983_s16, 4  ;;  %s911_s22 = int_to_ptr.vmem [resolvable:$false] %s910_s22 }
 0x201   : > { %s912_s28 = scalar_lea.vmem %s911_s22, 64  ;;  %p913_p2 = scmp.lt.s32.totalorder %s1283_s17, %s911_s22 }
 0x202   : > { %p908_p10 = pnand %p907_p8, %p1335_p11  ;;  %p914_p4 = scmp.lt.s32.totalorder %s912_s28, %s906_s20 }
 0x204   : > { %p909_p0 = pneg %p908_p10  ;;  %p915_p5 = por %p914_p4, %p913_p2 }
 0x206   : > { %p916_p7 = pnand %p915_p5, %p909_p0 }
 0x277   : > { %v487_v34 = vpop.xlane.xlu1 %486 }
 0x278   : > { %v496_v35 = vrot.slane %v487_v34, %v495_v33 }
 0x27a   : > { %499 = vst.msk [vmem:[%s200_s8] sm:$0x1] %vm498_vm7, %v496_v35 }
 0x27b   : > { %v491_v36 = vpop.xlane.xlu1 %490 }
 0x27c   : > { %v504_v37 = vrot.slane %v491_v36, %v495_v33 }
 0x27e   : > { %506 = vst.msk [vmem:[%s200_s8 + $0x1] sm:$0x1] %vm498_vm7, %v504_v37 }
 0x27f   : > { %919 = shalt.err (!%p916_p7)
}
 0x280   : > { %s920_s5 = scalar_lea.hbm %s1281_s27, 32  ;;  %s924_s9 = scalar_lea.hbm %s1328_s3, 64 }
 0x281   : > { %p921_p9 = scmp.ne.s32.totalorder %s1281_s27, %s920_s5  ;;  %p925_p6 = scmp.lt.u32.totalorder %s1281_s27, %s1328_s3 }
 0x282   : > { %p926_p12 = scmp.lt.u32.totalorder %s924_s9, %s920_s5  ;;  %p928_p8 = scmp.lt.u32.totalorder %s920_s5, %s1281_s27 }
 0x283   : > { %p922_p1 = pnand %p921_p9, %p1335_p11 }
 0x284   : > { %p927_p13 = por %p926_p12, %p925_p6 }
 0x285   : > { %p923_p3 = pneg %p922_p1 }
 0x286   : > { %p929_p10 = por %p928_p8, %p927_p13 }
 0x288   : > { %p930_p0 = pnand %p929_p10, %p923_p3 }
 0x28a   : > { %933 = shalt.err (!%p930_p0)
}
 0x28b   : > { %793 = dma.vmem_to_hbm [thread:$0]  (%p1335_p11), %s1283_s17, 32, %s1281_s27, %s513_s19  }
 0x28c PF: > { %s551_s4 = sand.u32 1, %s964_s12   ;;  %p1336_p2 = scmp.ne.s32.totalorder %s1333_s25, 0 }
 0x28d   : > { %p1337_p4 = scmp.ge.s32.totalorder %s976_s15, 2  ;;  %s552_s6 = scalar_lea.sflag [#allocation4], %s551_s4 }
 0x28f   : > { %p801_p5 = pnand %p1337_p4, %p1336_p2 }
 0x291   : > { %955 = dma.done.wait (!%p801_p5), %s552_s6, 128  }
 0x292   : > { %957 = vsyncadd (!%p801_p5), %s552_s6, 4294967168  ;;  %s561_s7 = scalar_lea.sflag [#allocation7], %s551_s4 }
 0x293   : > { %959 = dma.done.wait (!%p801_p5), %s561_s7, 32  }
 0x294   : > { %961 = vsyncadd (!%p801_p5), %s561_s7, 4294967264  ;;  %p20_p11 = scmp.ge.s32.totalorder %s1029_s18, 4   ;;  %s1338_s12 = smov %s968_s13 }
 0x295   : > { %s1339_s13 = smov %s972_s14  ;;  %s1340_s14 = smov %s1041_s21 }
 0x296   : > { %s1341_s15 = smov %s1029_s18  ;;  %22 = sbr.rel (!%p20_p11) target bundleno = 7 (0x7), region = 90 }
 0x29d   :  { %566 = vsyncpa [#allocation3], 1 }
 0x29e   :  { %568 = vsyncpa [#allocation3 + $0x1], 1 }
 0x29f   :  { %569 = vsyncpa [#allocation4], 1 }
 0x2a0   :  { %571 = vsyncpa [#allocation4 + $0x1], 1 }
 0x2a1   :  { %572 = vsyncpa [#allocation7], 1 }
 0x2a2   :  { %574 = vsyncpa [#allocation7 + $0x1], 1 }

</bundles_post_ra>
